<compile_context>
chip_gen: v6e
topology: v6e:2x2x1
jax: 0.10.0
libtpu: 0.0.40
codegen_flags: <defaults>
</compile_context>

<pallas_src>
import numpy as np
import jax
import jax.numpy as jnp
from jax.experimental import pallas as pl
from jax.experimental.pallas import tpu as pltpu

LANES = 128            # lane width: one batch sample per lane
MAX_TILE_ROWS = 1024   # sublane rows per grid step (1024*128 samples, 512 KiB f32 buffer)


def _round_up(v, m):
    return ((v + m - 1) // m) * m


def rbfn_kernel(c_ref, nbeta_ref, wr_ref, wx_ref, b_ref, x_ref, o_ref):
    """Scalar-unrolled RBFN forward on one lane-dense batch tile.

    c_ref:     SMEM [K*D]      centers, row-major flat (c[k, d] = c_ref[k*D + d])
    nbeta_ref: SMEM [K]        -beta (negation precomputed at init)
    wr_ref:    SMEM [n_out*K]  W[:, D:]   (wr[o, k] = wr_ref[o*K + k])
    wx_ref:    SMEM [n_out*D]  W[:, :D]   (wx[o, d] = wx_ref[o*D + d])
    b_ref:     SMEM [n_out]    bias
    x_ref:     VMEM [D, TR, 128]      lane-dense batch planes
    o_ref:     VMEM [n_out, TR, 128]  lane-dense scores
    """
    D = x_ref.shape[0]
    n_out = o_ref.shape[0]
    K = nbeta_ref.shape[0]

    x = [x_ref[d] for d in range(D)]                        # D planes of [TR, 128]

    # Linear part acting on x, plus bias (VPU scalar-broadcast; D, n_out tiny & static).
    acc = []
    for o in range(n_out):
        a = x[0] * wx_ref[o * D] + b_ref[o]
        for d in range(1, D):
            a = a + x[d] * wx_ref[o * D + d]
        acc.append(a)

    # Unrolled Gaussian RBF accumulation over the K *real* centers (VPU + EUP only).
    for k in range(K):
        diff = x[0] - c_ref[k * D]
        sq = diff * diff
        for d in range(1, D):
            diff = x[d] - c_ref[k * D + d]
            sq = sq + diff * diff
        radial = jnp.exp(nbeta_ref[k] * sq)                 # EUP, [TR, 128]
        for o in range(n_out):
            acc[o] = acc[o] + wr_ref[o * K + k] * radial

    for o in range(n_out):
        o_ref[o] = acc[o].astype(o_ref.dtype)


def prepare_rbfn_params(centers, beta, W, bias):
    """Flatten parameters ONCE (hoisted out of the call path); no lane padding needed.

    centers: [K, D]; beta: [1, K]; W: [n_out, D+K]; bias: [n_out].
    """
    K, D = centers.shape
    n_out = W.shape[0]
    c_flat = jnp.asarray(centers, jnp.float32).reshape(K * D)
    nbeta = (-jnp.asarray(beta, jnp.float32)).reshape(K)
    wx = jnp.asarray(W[:, :D], jnp.float32).reshape(n_out * D)
    wr = jnp.asarray(W[:, D:], jnp.float32).reshape(n_out * K)
    b = jnp.asarray(bias, jnp.float32).reshape(n_out)
    return (c_flat, nbeta, wr, wx, b)


def rbfn_forward(x, params):
    """x: [N, D] float32; params from prepare_rbfn_params. Returns [N, n_out]."""
    c_flat, nbeta, wr, wx, b = params
    N, D = x.shape
    n_out = b.shape[0]

    # Lane-dense batch layout: 128 samples per row of each D-plane.
    total_rows = pl.cdiv(N, LANES)
    # Tile rows: multiple of 8 sublanes, capped, and sized so the grid has >= 2
    # steps whenever the data allows (v7x has 2 TensorCores; "parallel" shards them).
    tile_rows = max(8, min(MAX_TILE_ROWS, _round_up(pl.cdiv(total_rows, 2), 8)))
    rows_pad = _round_up(total_rows, tile_rows)
    n_pad = rows_pad * LANES
    grid = (rows_pad // tile_rows,)

    xt = x.T                                      # [D, N]
    if n_pad != N:                                # pad only when actually needed
        xt = jnp.pad(xt, ((0, 0), (0, n_pad - N)))
    xp = xt.reshape(D, rows_pad, LANES)

    smem = pl.BlockSpec(memory_space=pltpu.MemorySpace.SMEM)
    out = pl.pallas_call(
        rbfn_kernel,
        out_shape=jax.ShapeDtypeStruct((n_out, rows_pad, LANES), jnp.float32),
        grid=grid,
        in_specs=[
            smem, smem, smem, smem, smem,                               # scalar params (SMEM)
            pl.BlockSpec((D, tile_rows, LANES), lambda i: (0, i, 0)),   # x planes, batch-tiled
        ],
        out_specs=pl.BlockSpec((n_out, tile_rows, LANES), lambda i: (0, i, 0)),
        compiler_params=pltpu.CompilerParams(
            dimension_semantics=("parallel",)),
    )(c_flat, nbeta, wr, wx, b, xp)

    return out.reshape(n_out, n_pad)[:, :N].T     # [N, n_out]


if __name__ == "__main__":
    key = jax.random.PRNGKey(0)
    k_c, k_x, k_w, k_b = jax.random.split(key, 4)

    K, D, n_out = 20, 1, 1   # shapes implied by RBFN(__init__): centers [20, 1], n_out = 1
    N = 16                   # small batch

    # Deterministic parameter init (synthetic; mirrors torch.rand / nn.Linear init ranges).
    centers = jax.random.uniform(k_c, (K, D), jnp.float32)                  # torch.rand(20, 1)
    beta = jnp.ones((1, K), jnp.float32) * 10.0                             # ones(1, 20) * 10
    bound = 1.0 / float(np.sqrt(K + D))
    W = jax.random.uniform(k_w, (n_out, K + D), jnp.float32, -bound, bound)
    bias = jax.random.uniform(k_b, (n_out,), jnp.float32, -bound, bound)

    x = jax.random.uniform(k_x, (N, D), jnp.float32)                        # batches [N, 1]

    # One-time parameter preparation (hoisted out of the call path).
    params = prepare_rbfn_params(centers, beta, W, bias)
    params = jax.tree_util.tree_map(jax.block_until_ready, params)

    fwd = jax.jit(rbfn_forward)
    out = jax.block_until_ready(fwd(x, params))

    # Pure-JAX reference of the exact PyTorch forward (HIGHEST-precision dot so the
    # check is not limited by the reference's default bf16 MXU passes).
    sq = jnp.sum((centers[None, :, :] - x[:, None, :]) ** 2, axis=2)        # [N, K]
    radial_ref = jnp.exp(-beta * sq)                                        # [N, K]
    feat = jnp.concatenate([x, radial_ref], axis=1)                         # [N, D+K]
    ref = jnp.dot(feat, W.T, precision=jax.lax.Precision.HIGHEST) + bias    # [N, n_out]

    assert out.shape == (N, n_out)
    assert np.allclose(np.asarray(out), np.asarray(ref), atol=1e-5, rtol=1e-5)
    print("KERNEL_OK")
</pallas_src>

<mosaic_0001>
module attributes {stable_mosaic.version = 11 : i64} {
  func.func @rbfn_kernel(%arg0: i32, %arg1: memref<20xf32, #tpu.memory_space<smem>>, %arg2: memref<20xf32, #tpu.memory_space<smem>>, %arg3: memref<20xf32, #tpu.memory_space<smem>>, %arg4: memref<1xf32, #tpu.memory_space<smem>>, %arg5: memref<1xf32, #tpu.memory_space<smem>>, %arg6: memref<1x8x128xf32, #tpu.memory_space<vmem>>, %arg7: memref<1x8x128xf32, #tpu.memory_space<vmem>>) attributes {dimension_semantics = [#tpu.dimension_semantics<parallel>], iteration_bounds = array<i64: 1>, scalar_prefetch = 0 : i64, scratch_operands = 0 : i64, tpu.core_type = #tpu.core_type<tc>, window_params = [{transform_indices = @transform_0, window_bounds = array<i64: 20>}, {transform_indices = @transform_1, window_bounds = array<i64: 20>}, {transform_indices = @transform_2, window_bounds = array<i64: 20>}, {transform_indices = @transform_3, window_bounds = array<i64: 1>}, {transform_indices = @transform_4, window_bounds = array<i64: 1>}, {transform_indices = @transform_5, window_bounds = array<i64: 1, 8, 128>}, {transform_indices = @transform_6, window_bounds = array<i64: 1, 8, 128>}]} {
    %c0 = arith.constant 0 : index
    %c0_0 = arith.constant 0 : index
    %c0_1 = arith.constant 0 : index
    %0 = vector.load %arg6[%c0, %c0_0, %c0_1] : memref<1x8x128xf32, #tpu.memory_space<vmem>>, vector<1x8x128xf32>
    %1 = vector.shape_cast %0 : vector<1x8x128xf32> to vector<8x128xf32>
    %c0_2 = arith.constant 0 : index
    %2 = memref.load %arg4[%c0_2] : memref<1xf32, #tpu.memory_space<smem>>
    %3 = vector.broadcast %2 : f32 to vector<8x128xf32>
    %4 = arith.mulf %1, %3 : vector<8x128xf32>
    %c0_3 = arith.constant 0 : index
    %5 = memref.load %arg5[%c0_3] : memref<1xf32, #tpu.memory_space<smem>>
    %6 = vector.broadcast %5 : f32 to vector<8x128xf32>
    %7 = arith.addf %4, %6 : vector<8x128xf32>
    %c0_4 = arith.constant 0 : index
    %8 = memref.load %arg1[%c0_4] : memref<20xf32, #tpu.memory_space<smem>>
    %9 = vector.broadcast %8 : f32 to vector<8x128xf32>
    %10 = arith.subf %1, %9 : vector<8x128xf32>
    %11 = arith.mulf %10, %10 : vector<8x128xf32>
    %c0_5 = arith.constant 0 : index
    %12 = memref.load %arg2[%c0_5] : memref<20xf32, #tpu.memory_space<smem>>
    %13 = vector.broadcast %12 : f32 to vector<8x128xf32>
    %14 = arith.mulf %13, %11 : vector<8x128xf32>
    %15 = math.exp %14 : vector<8x128xf32>
    %c0_6 = arith.constant 0 : index
    %16 = memref.load %arg3[%c0_6] : memref<20xf32, #tpu.memory_space<smem>>
    %17 = vector.broadcast %16 : f32 to vector<8x128xf32>
    %18 = arith.mulf %17, %15 : vector<8x128xf32>
    %19 = arith.addf %7, %18 : vector<8x128xf32>
    %c1 = arith.constant 1 : index
    %20 = memref.load %arg1[%c1] : memref<20xf32, #tpu.memory_space<smem>>
    %21 = vector.broadcast %20 : f32 to vector<8x128xf32>
    %22 = arith.subf %1, %21 : vector<8x128xf32>
    %23 = arith.mulf %22, %22 : vector<8x128xf32>
    %c1_7 = arith.constant 1 : index
    %24 = memref.load %arg2[%c1_7] : memref<20xf32, #tpu.memory_space<smem>>
    %25 = vector.broadcast %24 : f32 to vector<8x128xf32>
    %26 = arith.mulf %25, %23 : vector<8x128xf32>
    %27 = math.exp %26 : vector<8x128xf32>
    %c1_8 = arith.constant 1 : index
    %28 = memref.load %arg3[%c1_8] : memref<20xf32, #tpu.memory_space<smem>>
    %29 = vector.broadcast %28 : f32 to vector<8x128xf32>
    %30 = arith.mulf %29, %27 : vector<8x128xf32>
    %31 = arith.addf %19, %30 : vector<8x128xf32>
    %c2 = arith.constant 2 : index
    %32 = memref.load %arg1[%c2] : memref<20xf32, #tpu.memory_space<smem>>
    %33 = vector.broadcast %32 : f32 to vector<8x128xf32>
    %34 = arith.subf %1, %33 : vector<8x128xf32>
    %35 = arith.mulf %34, %34 : vector<8x128xf32>
    %c2_9 = arith.constant 2 : index
    %36 = memref.load %arg2[%c2_9] : memref<20xf32, #tpu.memory_space<smem>>
    %37 = vector.broadcast %36 : f32 to vector<8x128xf32>
    %38 = arith.mulf %37, %35 : vector<8x128xf32>
    %39 = math.exp %38 : vector<8x128xf32>
    %c2_10 = arith.constant 2 : index
    %40 = memref.load %arg3[%c2_10] : memref<20xf32, #tpu.memory_space<smem>>
    %41 = vector.broadcast %40 : f32 to vector<8x128xf32>
    %42 = arith.mulf %41, %39 : vector<8x128xf32>
    %43 = arith.addf %31, %42 : vector<8x128xf32>
    %c3 = arith.constant 3 : index
    %44 = memref.load %arg1[%c3] : memref<20xf32, #tpu.memory_space<smem>>
    %45 = vector.broadcast %44 : f32 to vector<8x128xf32>
    %46 = arith.subf %1, %45 : vector<8x128xf32>
    %47 = arith.mulf %46, %46 : vector<8x128xf32>
    %c3_11 = arith.constant 3 : index
    %48 = memref.load %arg2[%c3_11] : memref<20xf32, #tpu.memory_space<smem>>
    %49 = vector.broadcast %48 : f32 to vector<8x128xf32>
    %50 = arith.mulf %49, %47 : vector<8x128xf32>
    %51 = math.exp %50 : vector<8x128xf32>
    %c3_12 = arith.constant 3 : index
    %52 = memref.load %arg3[%c3_12] : memref<20xf32, #tpu.memory_space<smem>>
    %53 = vector.broadcast %52 : f32 to vector<8x128xf32>
    %54 = arith.mulf %53, %51 : vector<8x128xf32>
    %55 = arith.addf %43, %54 : vector<8x128xf32>
    %c4 = arith.constant 4 : index
    %56 = memref.load %arg1[%c4] : memref<20xf32, #tpu.memory_space<smem>>
    %57 = vector.broadcast %56 : f32 to vector<8x128xf32>
    %58 = arith.subf %1, %57 : vector<8x128xf32>
    %59 = arith.mulf %58, %58 : vector<8x128xf32>
    %c4_13 = arith.constant 4 : index
    %60 = memref.load %arg2[%c4_13] : memref<20xf32, #tpu.memory_space<smem>>
    %61 = vector.broadcast %60 : f32 to vector<8x128xf32>
    %62 = arith.mulf %61, %59 : vector<8x128xf32>
    %63 = math.exp %62 : vector<8x128xf32>
    %c4_14 = arith.constant 4 : index
    %64 = memref.load %arg3[%c4_14] : memref<20xf32, #tpu.memory_space<smem>>
    %65 = vector.broadcast %64 : f32 to vector<8x128xf32>
    %66 = arith.mulf %65, %63 : vector<8x128xf32>
    %67 = arith.addf %55, %66 : vector<8x128xf32>
    %c5 = arith.constant 5 : index
    %68 = memref.load %arg1[%c5] : memref<20xf32, #tpu.memory_space<smem>>
    %69 = vector.broadcast %68 : f32 to vector<8x128xf32>
    %70 = arith.subf %1, %69 : vector<8x128xf32>
    %71 = arith.mulf %70, %70 : vector<8x128xf32>
    %c5_15 = arith.constant 5 : index
    %72 = memref.load %arg2[%c5_15] : memref<20xf32, #tpu.memory_space<smem>>
    %73 = vector.broadcast %72 : f32 to vector<8x128xf32>
    %74 = arith.mulf %73, %71 : vector<8x128xf32>
    %75 = math.exp %74 : vector<8x128xf32>
    %c5_16 = arith.constant 5 : index
    %76 = memref.load %arg3[%c5_16] : memref<20xf32, #tpu.memory_space<smem>>
    %77 = vector.broadcast %76 : f32 to vector<8x128xf32>
    %78 = arith.mulf %77, %75 : vector<8x128xf32>
    %79 = arith.addf %67, %78 : vector<8x128xf32>
    %c6 = arith.constant 6 : index
    %80 = memref.load %arg1[%c6] : memref<20xf32, #tpu.memory_space<smem>>
    %81 = vector.broadcast %80 : f32 to vector<8x128xf32>
    %82 = arith.subf %1, %81 : vector<8x128xf32>
    %83 = arith.mulf %82, %82 : vector<8x128xf32>
    %c6_17 = arith.constant 6 : index
    %84 = memref.load %arg2[%c6_17] : memref<20xf32, #tpu.memory_space<smem>>
    %85 = vector.broadcast %84 : f32 to vector<8x128xf32>
    %86 = arith.mulf %85, %83 : vector<8x128xf32>
    %87 = math.exp %86 : vector<8x128xf32>
    %c6_18 = arith.constant 6 : index
    %88 = memref.load %arg3[%c6_18] : memref<20xf32, #tpu.memory_space<smem>>
    %89 = vector.broadcast %88 : f32 to vector<8x128xf32>
    %90 = arith.mulf %89, %87 : vector<8x128xf32>
    %91 = arith.addf %79, %90 : vector<8x128xf32>
    %c7 = arith.constant 7 : index
    %92 = memref.load %arg1[%c7] : memref<20xf32, #tpu.memory_space<smem>>
    %93 = vector.broadcast %92 : f32 to vector<8x128xf32>
    %94 = arith.subf %1, %93 : vector<8x128xf32>
    %95 = arith.mulf %94, %94 : vector<8x128xf32>
    %c7_19 = arith.constant 7 : index
    %96 = memref.load %arg2[%c7_19] : memref<20xf32, #tpu.memory_space<smem>>
    %97 = vector.broadcast %96 : f32 to vector<8x128xf32>
    %98 = arith.mulf %97, %95 : vector<8x128xf32>
    %99 = math.exp %98 : vector<8x128xf32>
    %c7_20 = arith.constant 7 : index
    %100 = memref.load %arg3[%c7_20] : memref<20xf32, #tpu.memory_space<smem>>
    %101 = vector.broadcast %100 : f32 to vector<8x128xf32>
    %102 = arith.mulf %101, %99 : vector<8x128xf32>
    %103 = arith.addf %91, %102 : vector<8x128xf32>
    %c8 = arith.constant 8 : index
    %104 = memref.load %arg1[%c8] : memref<20xf32, #tpu.memory_space<smem>>
    %105 = vector.broadcast %104 : f32 to vector<8x128xf32>
    %106 = arith.subf %1, %105 : vector<8x128xf32>
    %107 = arith.mulf %106, %106 : vector<8x128xf32>
    %c8_21 = arith.constant 8 : index
    %108 = memref.load %arg2[%c8_21] : memref<20xf32, #tpu.memory_space<smem>>
    %109 = vector.broadcast %108 : f32 to vector<8x128xf32>
    %110 = arith.mulf %109, %107 : vector<8x128xf32>
    %111 = math.exp %110 : vector<8x128xf32>
    %c8_22 = arith.constant 8 : index
    %112 = memref.load %arg3[%c8_22] : memref<20xf32, #tpu.memory_space<smem>>
    %113 = vector.broadcast %112 : f32 to vector<8x128xf32>
    %114 = arith.mulf %113, %111 : vector<8x128xf32>
    %115 = arith.addf %103, %114 : vector<8x128xf32>
    %c9 = arith.constant 9 : index
    %116 = memref.load %arg1[%c9] : memref<20xf32, #tpu.memory_space<smem>>
    %117 = vector.broadcast %116 : f32 to vector<8x128xf32>
    %118 = arith.subf %1, %117 : vector<8x128xf32>
    %119 = arith.mulf %118, %118 : vector<8x128xf32>
    %c9_23 = arith.constant 9 : index
    %120 = memref.load %arg2[%c9_23] : memref<20xf32, #tpu.memory_space<smem>>
    %121 = vector.broadcast %120 : f32 to vector<8x128xf32>
    %122 = arith.mulf %121, %119 : vector<8x128xf32>
    %123 = math.exp %122 : vector<8x128xf32>
    %c9_24 = arith.constant 9 : index
    %124 = memref.load %arg3[%c9_24] : memref<20xf32, #tpu.memory_space<smem>>
    %125 = vector.broadcast %124 : f32 to vector<8x128xf32>
    %126 = arith.mulf %125, %123 : vector<8x128xf32>
    %127 = arith.addf %115, %126 : vector<8x128xf32>
    %c10 = arith.constant 10 : index
    %128 = memref.load %arg1[%c10] : memref<20xf32, #tpu.memory_space<smem>>
    %129 = vector.broadcast %128 : f32 to vector<8x128xf32>
    %130 = arith.subf %1, %129 : vector<8x128xf32>
    %131 = arith.mulf %130, %130 : vector<8x128xf32>
    %c10_25 = arith.constant 10 : index
    %132 = memref.load %arg2[%c10_25] : memref<20xf32, #tpu.memory_space<smem>>
    %133 = vector.broadcast %132 : f32 to vector<8x128xf32>
    %134 = arith.mulf %133, %131 : vector<8x128xf32>
    %135 = math.exp %134 : vector<8x128xf32>
    %c10_26 = arith.constant 10 : index
    %136 = memref.load %arg3[%c10_26] : memref<20xf32, #tpu.memory_space<smem>>
    %137 = vector.broadcast %136 : f32 to vector<8x128xf32>
    %138 = arith.mulf %137, %135 : vector<8x128xf32>
    %139 = arith.addf %127, %138 : vector<8x128xf32>
    %c11 = arith.constant 11 : index
    %140 = memref.load %arg1[%c11] : memref<20xf32, #tpu.memory_space<smem>>
    %141 = vector.broadcast %140 : f32 to vector<8x128xf32>
    %142 = arith.subf %1, %141 : vector<8x128xf32>
    %143 = arith.mulf %142, %142 : vector<8x128xf32>
    %c11_27 = arith.constant 11 : index
    %144 = memref.load %arg2[%c11_27] : memref<20xf32, #tpu.memory_space<smem>>
    %145 = vector.broadcast %144 : f32 to vector<8x128xf32>
    %146 = arith.mulf %145, %143 : vector<8x128xf32>
    %147 = math.exp %146 : vector<8x128xf32>
    %c11_28 = arith.constant 11 : index
    %148 = memref.load %arg3[%c11_28] : memref<20xf32, #tpu.memory_space<smem>>
    %149 = vector.broadcast %148 : f32 to vector<8x128xf32>
    %150 = arith.mulf %149, %147 : vector<8x128xf32>
    %151 = arith.addf %139, %150 : vector<8x128xf32>
    %c12 = arith.constant 12 : index
    %152 = memref.load %arg1[%c12] : memref<20xf32, #tpu.memory_space<smem>>
    %153 = vector.broadcast %152 : f32 to vector<8x128xf32>
    %154 = arith.subf %1, %153 : vector<8x128xf32>
    %155 = arith.mulf %154, %154 : vector<8x128xf32>
    %c12_29 = arith.constant 12 : index
    %156 = memref.load %arg2[%c12_29] : memref<20xf32, #tpu.memory_space<smem>>
    %157 = vector.broadcast %156 : f32 to vector<8x128xf32>
    %158 = arith.mulf %157, %155 : vector<8x128xf32>
    %159 = math.exp %158 : vector<8x128xf32>
    %c12_30 = arith.constant 12 : index
    %160 = memref.load %arg3[%c12_30] : memref<20xf32, #tpu.memory_space<smem>>
    %161 = vector.broadcast %160 : f32 to vector<8x128xf32>
    %162 = arith.mulf %161, %159 : vector<8x128xf32>
    %163 = arith.addf %151, %162 : vector<8x128xf32>
    %c13 = arith.constant 13 : index
    %164 = memref.load %arg1[%c13] : memref<20xf32, #tpu.memory_space<smem>>
    %165 = vector.broadcast %164 : f32 to vector<8x128xf32>
    %166 = arith.subf %1, %165 : vector<8x128xf32>
    %167 = arith.mulf %166, %166 : vector<8x128xf32>
    %c13_31 = arith.constant 13 : index
    %168 = memref.load %arg2[%c13_31] : memref<20xf32, #tpu.memory_space<smem>>
    %169 = vector.broadcast %168 : f32 to vector<8x128xf32>
    %170 = arith.mulf %169, %167 : vector<8x128xf32>
    %171 = math.exp %170 : vector<8x128xf32>
    %c13_32 = arith.constant 13 : index
    %172 = memref.load %arg3[%c13_32] : memref<20xf32, #tpu.memory_space<smem>>
    %173 = vector.broadcast %172 : f32 to vector<8x128xf32>
    %174 = arith.mulf %173, %171 : vector<8x128xf32>
    %175 = arith.addf %163, %174 : vector<8x128xf32>
    %c14 = arith.constant 14 : index
    %176 = memref.load %arg1[%c14] : memref<20xf32, #tpu.memory_space<smem>>
    %177 = vector.broadcast %176 : f32 to vector<8x128xf32>
    %178 = arith.subf %1, %177 : vector<8x128xf32>
    %179 = arith.mulf %178, %178 : vector<8x128xf32>
    %c14_33 = arith.constant 14 : index
    %180 = memref.load %arg2[%c14_33] : memref<20xf32, #tpu.memory_space<smem>>
    %181 = vector.broadcast %180 : f32 to vector<8x128xf32>
    %182 = arith.mulf %181, %179 : vector<8x128xf32>
    %183 = math.exp %182 : vector<8x128xf32>
    %c14_34 = arith.constant 14 : index
    %184 = memref.load %arg3[%c14_34] : memref<20xf32, #tpu.memory_space<smem>>
    %185 = vector.broadcast %184 : f32 to vector<8x128xf32>
    %186 = arith.mulf %185, %183 : vector<8x128xf32>
    %187 = arith.addf %175, %186 : vector<8x128xf32>
    %c15 = arith.constant 15 : index
    %188 = memref.load %arg1[%c15] : memref<20xf32, #tpu.memory_space<smem>>
    %189 = vector.broadcast %188 : f32 to vector<8x128xf32>
    %190 = arith.subf %1, %189 : vector<8x128xf32>
    %191 = arith.mulf %190, %190 : vector<8x128xf32>
    %c15_35 = arith.constant 15 : index
    %192 = memref.load %arg2[%c15_35] : memref<20xf32, #tpu.memory_space<smem>>
    %193 = vector.broadcast %192 : f32 to vector<8x128xf32>
    %194 = arith.mulf %193, %191 : vector<8x128xf32>
    %195 = math.exp %194 : vector<8x128xf32>
    %c15_36 = arith.constant 15 : index
    %196 = memref.load %arg3[%c15_36] : memref<20xf32, #tpu.memory_space<smem>>
    %197 = vector.broadcast %196 : f32 to vector<8x128xf32>
    %198 = arith.mulf %197, %195 : vector<8x128xf32>
    %199 = arith.addf %187, %198 : vector<8x128xf32>
    %c16 = arith.constant 16 : index
    %200 = memref.load %arg1[%c16] : memref<20xf32, #tpu.memory_space<smem>>
    %201 = vector.broadcast %200 : f32 to vector<8x128xf32>
    %202 = arith.subf %1, %201 : vector<8x128xf32>
    %203 = arith.mulf %202, %202 : vector<8x128xf32>
    %c16_37 = arith.constant 16 : index
    %204 = memref.load %arg2[%c16_37] : memref<20xf32, #tpu.memory_space<smem>>
    %205 = vector.broadcast %204 : f32 to vector<8x128xf32>
    %206 = arith.mulf %205, %203 : vector<8x128xf32>
    %207 = math.exp %206 : vector<8x128xf32>
    %c16_38 = arith.constant 16 : index
    %208 = memref.load %arg3[%c16_38] : memref<20xf32, #tpu.memory_space<smem>>
    %209 = vector.broadcast %208 : f32 to vector<8x128xf32>
    %210 = arith.mulf %209, %207 : vector<8x128xf32>
    %211 = arith.addf %199, %210 : vector<8x128xf32>
    %c17 = arith.constant 17 : index
    %212 = memref.load %arg1[%c17] : memref<20xf32, #tpu.memory_space<smem>>
    %213 = vector.broadcast %212 : f32 to vector<8x128xf32>
    %214 = arith.subf %1, %213 : vector<8x128xf32>
    %215 = arith.mulf %214, %214 : vector<8x128xf32>
    %c17_39 = arith.constant 17 : index
    %216 = memref.load %arg2[%c17_39] : memref<20xf32, #tpu.memory_space<smem>>
    %217 = vector.broadcast %216 : f32 to vector<8x128xf32>
    %218 = arith.mulf %217, %215 : vector<8x128xf32>
    %219 = math.exp %218 : vector<8x128xf32>
    %c17_40 = arith.constant 17 : index
    %220 = memref.load %arg3[%c17_40] : memref<20xf32, #tpu.memory_space<smem>>
    %221 = vector.broadcast %220 : f32 to vector<8x128xf32>
    %222 = arith.mulf %221, %219 : vector<8x128xf32>
    %223 = arith.addf %211, %222 : vector<8x128xf32>
    %c18 = arith.constant 18 : index
    %224 = memref.load %arg1[%c18] : memref<20xf32, #tpu.memory_space<smem>>
    %225 = vector.broadcast %224 : f32 to vector<8x128xf32>
    %226 = arith.subf %1, %225 : vector<8x128xf32>
    %227 = arith.mulf %226, %226 : vector<8x128xf32>
    %c18_41 = arith.constant 18 : index
    %228 = memref.load %arg2[%c18_41] : memref<20xf32, #tpu.memory_space<smem>>
    %229 = vector.broadcast %228 : f32 to vector<8x128xf32>
    %230 = arith.mulf %229, %227 : vector<8x128xf32>
    %231 = math.exp %230 : vector<8x128xf32>
    %c18_42 = arith.constant 18 : index
    %232 = memref.load %arg3[%c18_42] : memref<20xf32, #tpu.memory_space<smem>>
    %233 = vector.broadcast %232 : f32 to vector<8x128xf32>
    %234 = arith.mulf %233, %231 : vector<8x128xf32>
    %235 = arith.addf %223, %234 : vector<8x128xf32>
    %c19 = arith.constant 19 : index
    %236 = memref.load %arg1[%c19] : memref<20xf32, #tpu.memory_space<smem>>
    %237 = vector.broadcast %236 : f32 to vector<8x128xf32>
    %238 = arith.subf %1, %237 : vector<8x128xf32>
    %239 = arith.mulf %238, %238 : vector<8x128xf32>
    %c19_43 = arith.constant 19 : index
    %240 = memref.load %arg2[%c19_43] : memref<20xf32, #tpu.memory_space<smem>>
    %241 = vector.broadcast %240 : f32 to vector<8x128xf32>
    %242 = arith.mulf %241, %239 : vector<8x128xf32>
    %243 = math.exp %242 : vector<8x128xf32>
    %c19_44 = arith.constant 19 : index
    %244 = memref.load %arg3[%c19_44] : memref<20xf32, #tpu.memory_space<smem>>
    %245 = vector.broadcast %244 : f32 to vector<8x128xf32>
    %246 = arith.mulf %245, %243 : vector<8x128xf32>
    %247 = arith.addf %235, %246 : vector<8x128xf32>
    %c0_45 = arith.constant 0 : index
    %c0_46 = arith.constant 0 : index
    %c0_47 = arith.constant 0 : index
    %248 = vector.load %arg7[%c0_45, %c0_46, %c0_47] : memref<1x8x128xf32, #tpu.memory_space<vmem>>, vector<1x8x128xf32>
    %249 = vector.shape_cast %248 : vector<1x8x128xf32> to vector<8x128xf32>
    %250 = vector.shape_cast %247 : vector<8x128xf32> to vector<1x8x128xf32>
    tpu.vector_store %arg7[%c0_45, %c0_46, %c0_47], %250 {strides = array<i32>} : memref<1x8x128xf32, #tpu.memory_space<vmem>>, vector<1x8x128xf32>,
    return
  }
  func.func @transform_0(%arg0: i32) -> i32 {
    %c0_i32 = arith.constant 0 : i32
    %c0_i32_0 = arith.constant 0 : i32
    return %c0_i32 : i32
  }
  func.func @transform_1(%arg0: i32) -> i32 {
    %c0_i32 = arith.constant 0 : i32
    %c0_i32_0 = arith.constant 0 : i32
    return %c0_i32 : i32
  }
  func.func @transform_2(%arg0: i32) -> i32 {
    %c0_i32 = arith.constant 0 : i32
    %c0_i32_0 = arith.constant 0 : i32
    return %c0_i32 : i32
  }
  func.func @transform_3(%arg0: i32) -> i32 {
    %c0_i32 = arith.constant 0 : i32
    %c0_i32_0 = arith.constant 0 : i32
    return %c0_i32 : i32
  }
  func.func @transform_4(%arg0: i32) -> i32 {
    %c0_i32 = arith.constant 0 : i32
    %c0_i32_0 = arith.constant 0 : i32
    return %c0_i32 : i32
  }
  func.func @transform_5(%arg0: i32) -> (i32, i32, i32) {
    %c0_i32 = arith.constant 0 : i32
    %c0_i32_0 = arith.constant 0 : i32
    %c0_i32_1 = arith.constant 0 : i32
    return %c0_i32, %arg0, %c0_i32_0 : i32, i32, i32
  }
  func.func @transform_6(%arg0: i32) -> (i32, i32, i32) {
    %c0_i32 = arith.constant 0 : i32
    %c0_i32_0 = arith.constant 0 : i32
    %c0_i32_1 = arith.constant 0 : i32
    return %c0_i32, %arg0, %c0_i32_0 : i32, i32, i32
  }
}

</mosaic_0001>

<bundles_post_ra>
// kernel: rbfn_forward.1
= control target key start
LH: loop header
LB: loop body
LE: loop exit
PB: predicated region body
PF: predicated region fallthrough
CT: control target
= control target key end

     0   :  { %13 = vsyncpa [#allocation5], 0  ;;  %s683_s0 = inlined_call_operand.vmem [shape: f32[20], index: 0, kind: input, shape index: {}]   ;;  %s684_s1 = inlined_call_operand.vmem [shape: f32[20], index: 1, kind: input, shape index: {}]   ;;  %s685_s2 = inlined_call_operand.vmem [shape: f32[20], index: 2, kind: input, shape index: {}]   ;;  %s686_s3 = inlined_call_operand.<no memory space> [shape: f32[1], index: 3, kind: input, shape index: {}]   ;;  %s687_s4 = inlined_call_operand.<no memory space> [shape: f32[1], index: 4, kind: input, shape index: {}]   ;;  %s688_s5 = inlined_call_operand.vmem [shape: f32[1,8,128], index: 5, kind: input, shape index: {}]   ;;  %s689_s6 = inlined_call_operand.vmem [shape: f32[1,8,128], index: 6, kind: output, shape index: {}]  }
   0x1   :  { %14 = vsyncpa [#allocation7], 0  ;;  %s31_s23 = sshll.u32 %s684_s1, 4  ;;  %s21_s26 = sshll.u32 %s683_s0, 4  ;;  %s32_s23 = int_to_ptr.vmem [resolvable:$true] %s31_s23  ;;  %s22_s26 = int_to_ptr.vmem [resolvable:$true] %s21_s26 }
   0x2   :  { %s435_s27 = scalar_lea.vmem %s32_s23, 16  ;;  %p440_p1 = scmp.lt.s32.totalorder %s32_s23, %s32_s23 }
   0x3   :  { %p436_p0 = scmp.ne.s32.totalorder %s32_s23, %s435_s27  ;;  %p441_p2 = scmp.lt.s32.totalorder %s435_s27, %s435_s27 }
   0x5   :  { %p442_p3 = por %p441_p2, %p440_p1 }
   0x7   :  { %p443_p4 = pnand %p442_p3, %p436_p0 }
   0x9   :  { %446 = shalt.err (!%p443_p4)
}
   0xa   :  { %s475_s28 = smov [#allocation6]   ;;  %s447_s29 = scalar_lea.vmem %s22_s26, 16 }
   0xb   :  { %34 = dma.vmem_to_smem %s32_s23, 16, %s475_s28, [#allocation7]  }
   0xc   :  { %p448_p5 = scmp.ne.s32.totalorder %s22_s26, %s447_s29  ;;  %p452_p6 = scmp.lt.s32.totalorder %s22_s26, %s22_s26 }
   0xd   :  { %p453_p7 = scmp.lt.s32.totalorder %s447_s29, %s447_s29 }
   0xf   :  { %p454_p8 = por %p453_p7, %p452_p6 }
  0x11   :  { %p455_p9 = pnand %p454_p8, %p448_p5 }
  0x13   :  { %458 = shalt.err (!%p455_p9)
}
  0x14   :  { %s476_s1 = smov [#allocation4]   ;;  %s41_s7 = sshll.u32 %s685_s2, 4  ;;  %s42_s7 = int_to_ptr.vmem [resolvable:$true] %s41_s7 }
  0x15   :  { %24 = dma.vmem_to_smem %s22_s26, 16, %s476_s1, [#allocation5]  }
  0x16   :  { %s459_s8 = scalar_lea.vmem %s42_s7, 16  ;;  %p464_p11 = scmp.lt.s32.totalorder %s42_s7, %s42_s7 }
  0x17   :  { %p460_p10 = scmp.ne.s32.totalorder %s42_s7, %s459_s8  ;;  %p465_p12 = scmp.lt.s32.totalorder %s459_s8, %s459_s8 }
  0x19   :  { %p466_p13 = por %p465_p12, %p464_p11 }
  0x1b   :  { %p467_p0 = pnand %p466_p13, %p460_p10 }
  0x1d   :  { %470 = shalt.err (!%p467_p0)
}
  0x1e   :  { %s477_s9 = smov [#allocation8]  }
  0x1f   :  { %44 = dma.vmem_to_smem %s42_s7, 16, %s477_s9, [#allocation7]  }
  0x20   :  { %471 = dma.done.wait [#allocation5], 16  }
  0x21   :  { %472 = vsyncadd [#allocation5], 4294967280 }
  0x22   :  { %473 = dma.done.wait [#allocation7], 32  }
  0x23   :  { %474 = vsyncadd [#allocation7], 4294967264 }
  0x24   :  { %60 = sfence }
  0x25   :  { %s68_s10 = sld [smem:[#allocation4]]  ;;  %v525_v0 = vld [vmem:[%s688_s5] sm:$0xff]  ;;  %v63_v25 = vstv %s686_s3  ;;  %v66_v35 = vstv %s687_s4 }
  0x26   :  { %s72_s11 = sld [smem:[#allocation6]]  ;;  %v64_v32 = vmul.f32 %v63_v25, %v525_v0 }
  0x27   :  { %s335_s12 = sld [smem:[#allocation4 + $0x1]] }
  0x28   :  { %s336_s14 = sld [smem:[#allocation6 + $0x1]]  ;;  %v67_v43 = vadd.f32 %v66_v35, %v64_v32 }
  0x29   :  { %s338_s15 = sld [smem:[#allocation4 + $0x2]] }
  0x2a   :  { %s339_s16 = sld [smem:[#allocation6 + $0x2]] }
  0x2b   :  { %v69_v1 = vstv %s68_s10  ;;  %s341_s17 = sld [smem:[#allocation4 + $0x3]] }
  0x2c   :  { %v70_v2 = vsub.f32 %v525_v0, %v69_v1  ;;  %v73_v3 = vstv %s72_s11  ;;  %s342_s18 = sld [smem:[#allocation6 + $0x3]] }
  0x2d   :  { %v82_v5 = vstv %s335_s12  ;;  %s344_s19 = sld [smem:[#allocation4 + $0x4]] }
  0x2e   :  { %v71_v4 = vmul.f32 %v70_v2, %v70_v2  ;;  %v83_v6 = vsub.f32 %v525_v0, %v82_v5  ;;  %v86_v8 = vstv %s336_s14  ;;  %s530_s5 = sld [smem:[#allocation6 + $0x4]] }
  0x2f   :  { %v95_v10 = vstv %s338_s15  ;;  %s347_s20 = sld [smem:[#allocation4 + $0x5]] }
  0x30   :  { %v74_v7 = vmul.f32 %v73_v3, %v71_v4  ;;  %v84_v9 = vmul.f32 %v83_v6, %v83_v6  ;;  %v96_v12 = vsub.f32 %v525_v0, %v95_v10  ;;  %v99_v14 = vstv %s339_s16  ;;  %s533_s21 = sld [smem:[#allocation6 + $0x5]] }
  0x31   :  { %v108_v16 = vstv %s341_s17  ;;  %s535_s22 = sld [smem:[#allocation8]] }
  0x32   :  { %v75_v11 = vmul.f32 1.442695, %v74_v7  ;;  %v87_v13 = vmul.f32 %v86_v8, %v84_v9  ;;  %v97_v15 = vmul.f32 %v96_v12, %v96_v12  ;;  %v109_v18 = vsub.f32 %v525_v0, %v108_v16  ;;  %s350_s23 = sld [smem:[#allocation4 + $0x6]] }
  0x33   :  { %v112_v20 = vstv %s342_s18  ;;  %v121_v22 = vstv %s344_s19  ;;  %s538_s24 = sld [smem:[#allocation6 + $0x6]] }
  0x34   :  { %395 = vpow2.f32 %v75_v11  ;;  %v88_v17 = vmul.f32 1.442695, %v87_v13  ;;  %v100_v19 = vmul.f32 %v99_v14, %v97_v15  ;;  %v110_v21 = vmul.f32 %v109_v18, %v109_v18  ;;  %s543_s27 = sld [smem:[#allocation8 + $0x1]] }
  0x35   :  { %v122_v24 = vsub.f32 %v525_v0, %v121_v22  ;;  %v125_v27 = vstv %s530_s5  ;;  %v134_v29 = vstv %s347_s20  ;;  %s353_s28 = sld [smem:[#allocation4 + $0x7]] }
  0x36   :  { %397 = vpow2.f32 %v88_v17  ;;  %v101_v23 = vmul.f32 1.442695, %v100_v19  ;;  %v113_v26 = vmul.f32 %v112_v20, %v110_v21  ;;  %v135_v31 = vsub.f32 %v525_v0, %v134_v29  ;;  %s547_s29 = sld [smem:[#allocation6 + $0x7]] }
  0x37   :  { %v123_v28 = vmul.f32 %v122_v24, %v122_v24  ;;  %s550_s1 = sld [smem:[#allocation8 + $0x2]]  ;;  %v138_v34 = vstv %s533_s21  ;;  %v78_v40 = vstv %s535_s22 }
  0x38   :  { %399 = vpow2.f32 %v101_v23  ;;  %v114_v30 = vmul.f32 1.442695, %v113_v26  ;;  %v136_v36 = vmul.f32 %v135_v31, %v135_v31  ;;  %v147_v37 = vstv %s350_s23  ;;  %s356_s30 = sld [smem:[#allocation4 + $0x8]] }
  0x39   :  { %v126_v33 = vmul.f32 %v125_v27, %v123_v28  ;;  %v148_v39 = vsub.f32 %v525_v0, %v147_v37  ;;  %s557_s7 = sld [smem:[#allocation6 + $0x8]]  ;;  %v151_v42 = vstv %s538_s24 }
  0x3a   :  { %401 = vpow2.f32 %v114_v30  ;;  %s560_s8 = sld [smem:[#allocation8 + $0x3]]  ;;  %v139_v41 = vmul.f32 %v138_v34, %v136_v36  ;;  %v91_v50 = vstv %s543_s27 }
  0x3b   :  { %v127_v38 = vmul.f32 1.442695, %v126_v33  ;;  %v149_v44 = vmul.f32 %v148_v39, %v148_v39  ;;  %v160_v45 = vstv %s353_s28  ;;  %s563_s4 = sld [smem:[#allocation4 + $0x9]] }
  0x3c   :  { %v140_v47 = vmul.f32 1.442695, %v139_v41  ;;  %v161_v48 = vsub.f32 %v525_v0, %v160_v45  ;;  %s566_s9 = sld [smem:[#allocation6 + $0x9]]  ;;  %v164_v52 = vstv %s547_s29 }
  0x3d   :  { %403 = vpow2.f32 %v127_v38  ;;  %s569_s10 = sld [smem:[#allocation8 + $0x4]]  ;;  %v152_v51 = vmul.f32 %v151_v42, %v149_v44  ;;  %v104_v60 = vstv %s550_s1 }
  0x3e   :  { %405 = vpow2.f32 %v140_v47  ;;  %v162_v53 = vmul.f32 %v161_v48, %v161_v48  ;;  %v173_v54 = vstv %s356_s30  ;;  %s572_s11 = sld [smem:[#allocation4 + $0xa]] }
  0x3f   :  { %v153_v57 = vmul.f32 1.442695, %v152_v51  ;;  %v174_v58 = vsub.f32 %v525_v0, %v173_v54  ;;  %s575_s12 = sld [smem:[#allocation6 + $0xa]]  ;;  %v177_v62 = vstv %s557_s7 }
  0x40   :  { %s578_s13 = sld [smem:[#allocation8 + $0x5]]  ;;  %v165_v61 = vmul.f32 %v164_v52, %v162_v53  ;;  %v117_v7 = vstv %s560_s8 }
  0x41   :  { %v396_v46 = vpop.eup %395  ;;  %407 = vpow2.f32 %v153_v57  ;;  %v175_v63 = vmul.f32 %v174_v58, %v174_v58  ;;  %v186_v1 = vstv %s563_s4  ;;  %s582_s2 = sld [smem:[#allocation4 + $0xb]] }
  0x42   :  { %v79_v49 = vmul.f32 %v396_v46, %v78_v40  ;;  %v166_v4 = vmul.f32 1.442695, %v165_v61  ;;  %v187_v5 = vsub.f32 %v525_v0, %v186_v1  ;;  %s585_s14 = sld [smem:[#allocation6 + $0xb]]  ;;  %v190_v9 = vstv %s566_s9 }
  0x43   :  { %v398_v55 = vpop.eup %397  ;;  %s588_s15 = sld [smem:[#allocation8 + $0x6]]  ;;  %v178_v8 = vmul.f32 %v177_v62, %v175_v63  ;;  %v130_v17 = vstv %s569_s10 }
  0x44   :  { %v80_v56 = vadd.f32 %v79_v49, %v67_v43  ;;  %v92_v59 = vmul.f32 %v398_v55, %v91_v50  ;;  %409 = vpow2.f32 %v166_v4  ;;  %v188_v10 = vmul.f32 %v187_v5, %v187_v5  ;;  %s592_s16 = sld [smem:[#allocation4 + $0xc]] }
  0x45   :  { %v400_v2 = vpop.eup %399  ;;  %v199_v11 = vstv %s572_s11  ;;  %v179_v14 = vmul.f32 1.442695, %v178_v8  ;;  %s595_s17 = sld [smem:[#allocation6 + $0xc]]  ;;  %v203_v19 = vstv %s575_s12 }
  0x46   :  { %v93_v3 = vadd.f32 %v92_v59, %v80_v56  ;;  %v105_v6 = vmul.f32 %v400_v2, %v104_v60  ;;  %v200_v15 = vsub.f32 %v525_v0, %v199_v11  ;;  %s598_s18 = sld [smem:[#allocation8 + $0x7]]  ;;  %v191_v18 = vmul.f32 %v190_v9, %v188_v10 }
  0x47   :  { %v402_v12 = vpop.eup %401  ;;  %411 = vpow2.f32 %v179_v14  ;;  %v212_v21 = vstv %s582_s2  ;;  %s602_s19 = sld [smem:[#allocation4 + $0xd]]  ;;  %v143_v27 = vstv %s578_s13 }
  0x48   :  { %v106_v13 = vadd.f32 %v105_v6, %v93_v3  ;;  %v118_v16 = vmul.f32 %v402_v12, %v117_v7  ;;  %v201_v20 = vmul.f32 %v200_v15, %v200_v15  ;;  %v192_v24 = vmul.f32 1.442695, %v191_v18  ;;  %s605_s5 = sld [smem:[#allocation6 + $0xd]] }
  0x49   :  { %v213_v25 = vsub.f32 %v525_v0, %v212_v21  ;;  %s608_s20 = sld [smem:[#allocation8 + $0x8]]  ;;  %v216_v29 = vstv %s585_s14  ;;  %v156_v37 = vstv %s588_s15 }
  0x4a   :  { %v404_v22 = vpop.eup %403  ;;  %v119_v23 = vadd.f32 %v118_v16, %v106_v13  ;;  %v204_v28 = vmul.f32 %v203_v19, %v201_v20  ;;  %413 = vpow2.f32 %v192_v24  ;;  %v225_v31 = vstv %s592_s16  ;;  %s612_s21 = sld [smem:[#allocation4 + $0xe]] }
  0x4b   :  { %v131_v26 = vmul.f32 %v404_v22, %v130_v17  ;;  %v214_v30 = vmul.f32 %v213_v25, %v213_v25  ;;  %v406_v32 = vpop.eup %405  ;;  %v226_v35 = vsub.f32 %v525_v0, %v225_v31  ;;  %s615_s22 = sld [smem:[#allocation6 + $0xe]]  ;;  %v229_v39 = vstv %s595_s17 }
  0x4c   :  { %v205_v34 = vmul.f32 1.442695, %v204_v28  ;;  %v144_v36 = vmul.f32 %v406_v32, %v143_v27  ;;  %s618_s23 = sld [smem:[#allocation8 + $0x9]]  ;;  %v169_v47 = vstv %s598_s18 }
  0x4d   :  { %v132_v33 = vadd.f32 %v131_v26, %v119_v23  ;;  %v217_v38 = vmul.f32 %v216_v29, %v214_v30  ;;  %v227_v40 = vmul.f32 %v226_v35, %v226_v35  ;;  %v238_v41 = vstv %s602_s19  ;;  %s622_s24 = sld [smem:[#allocation4 + $0xf]] }
  0x4e   :  { %415 = vpow2.f32 %v205_v34  ;;  %v408_v42 = vpop.eup %407  ;;  %v239_v45 = vsub.f32 %v525_v0, %v238_v41  ;;  %s625_s25 = sld [smem:[#allocation6 + $0xf]]  ;;  %v242_v49 = vstv %s605_s5 }
  0x4f   :  { %v145_v43 = vadd.f32 %v144_v36, %v132_v33  ;;  %v218_v44 = vmul.f32 1.442695, %v217_v38  ;;  %v157_v46 = vmul.f32 %v408_v42, %v156_v37  ;;  %s628_s26 = sld [smem:[#allocation8 + $0xa]]  ;;  %v230_v48 = vmul.f32 %v229_v39, %v227_v40 }
  0x50   :  { %v240_v50 = vmul.f32 %v239_v45, %v239_v45  ;;  %v251_v51 = vstv %s612_s21  ;;  %s632_s27 = sld [smem:[#allocation4 + $0x10]]  ;;  %v182_v57 = vstv %s608_s20 }
  0x51   :  { %417 = vpow2.f32 %v218_v44  ;;  %v410_v52 = vpop.eup %409  ;;  %v158_v53 = vadd.f32 %v157_v46, %v145_v43  ;;  %v231_v54 = vmul.f32 1.442695, %v230_v48  ;;  %v252_v55 = vsub.f32 %v525_v0, %v251_v51  ;;  %s635_s28 = sld [smem:[#allocation6 + $0x10]] }
  0x52   :  { %v170_v56 = vmul.f32 %v410_v52, %v169_v47  ;;  %s638_s29 = sld [smem:[#allocation8 + $0xb]]  ;;  %v243_v58 = vmul.f32 %v242_v49, %v240_v50  ;;  %v255_v59 = vstv %s615_s22  ;;  %v195_v4 = vstv %s618_s23 }
  0x53   :  { %419 = vpow2.f32 %v231_v54  ;;  %v253_v60 = vmul.f32 %v252_v55, %v252_v55  ;;  %v264_v61 = vstv %s622_s24  ;;  %s642_s1 = sld [smem:[#allocation4 + $0x11]] }
  0x54   :  { %v412_v62 = vpop.eup %411  ;;  %v171_v63 = vadd.f32 %v170_v56, %v158_v53  ;;  %v244_v1 = vmul.f32 1.442695, %v243_v58  ;;  %v265_v2 = vsub.f32 %v525_v0, %v264_v61  ;;  %s645_s3 = sld [smem:[#allocation6 + $0x11]]  ;;  %v268_v6 = vstv %s625_s25 }
  0x55   :  { %v183_v3 = vmul.f32 %v412_v62, %v182_v57  ;;  %s648_s0 = sld [smem:[#allocation8 + $0xc]]  ;;  %v256_v5 = vmul.f32 %v255_v59, %v253_v60  ;;  %v208_v14 = vstv %s628_s26 }
  0x56   :  { %421 = vpow2.f32 %v244_v1  ;;  %v266_v7 = vmul.f32 %v265_v2, %v265_v2  ;;  %v277_v8 = vstv %s632_s27  ;;  %s652_s30 = sld [smem:[#allocation4 + $0x12]] }
  0x57   :  { %v414_v9 = vpop.eup %413  ;;  %v184_v10 = vadd.f32 %v183_v3, %v171_v63  ;;  %v257_v11 = vmul.f32 1.442695, %v256_v5  ;;  %v278_v12 = vsub.f32 %v525_v0, %v277_v8  ;;  %s655_s7 = sld [smem:[#allocation6 + $0x12]]  ;;  %v281_v16 = vstv %s635_s28 }
  0x58   :  { %v196_v13 = vmul.f32 %v414_v9, %v195_v4  ;;  %s658_s8 = sld [smem:[#allocation8 + $0xd]]  ;;  %v269_v15 = vmul.f32 %v268_v6, %v266_v7  ;;  %v221_v24 = vstv %s638_s29 }
  0x59   :  { %423 = vpow2.f32 %v257_v11  ;;  %v279_v17 = vmul.f32 %v278_v12, %v278_v12  ;;  %v290_v18 = vstv %s642_s1  ;;  %s389_s4 = sld [smem:[#allocation4 + $0x13]] }
  0x5a   :  { %v197_v20 = vadd.f32 %v196_v13, %v184_v10  ;;  %v270_v21 = vmul.f32 1.442695, %v269_v15  ;;  %v291_v22 = vsub.f32 %v525_v0, %v290_v18  ;;  %s663_s9 = sld [smem:[#allocation6 + $0x13]]  ;;  %v294_v26 = vstv %s645_s3 }
  0x5b   :  { %v416_v19 = vpop.eup %415  ;;  %v282_v25 = vmul.f32 %v281_v16, %v279_v17  ;;  %s667_s10 = sld [smem:[#allocation8 + $0xe]]  ;;  %v234_v34 = vstv %s648_s0 }
  0x5c   :  { %v209_v23 = vmul.f32 %v416_v19, %v208_v14  ;;  %425 = vpow2.f32 %v270_v21  ;;  %v292_v27 = vmul.f32 %v291_v22, %v291_v22  ;;  %v303_v28 = vstv %s652_s30  ;;  %s673_s11 = sld [smem:[#allocation8 + $0xf]] }
  0x5d   :  { %v283_v31 = vmul.f32 1.442695, %v282_v25  ;;  %v304_v32 = vsub.f32 %v525_v0, %v303_v28  ;;  %v307_v36 = vstv %s655_s7  ;;  %s382_s12 = sld [smem:[#allocation8 + $0x10]] }
  0x5e   :  { %v418_v29 = vpop.eup %417  ;;  %v210_v30 = vadd.f32 %v209_v23, %v197_v20  ;;  %v295_v35 = vmul.f32 %v294_v26, %v292_v27  ;;  %v247_v44 = vstv %s658_s8  ;;  %s385_s13 = sld [smem:[#allocation8 + $0x11]] }
  0x5f   :  { %v222_v33 = vmul.f32 %v418_v29, %v221_v24  ;;  %427 = vpow2.f32 %v283_v31  ;;  %v305_v37 = vmul.f32 %v304_v32, %v304_v32  ;;  %v316_v38 = vstv %s389_s4  ;;  %s388_s2 = sld [smem:[#allocation8 + $0x12]] }
  0x60   :  { %v420_v39 = vpop.eup %419  ;;  %v296_v41 = vmul.f32 1.442695, %v295_v35  ;;  %v317_v42 = vsub.f32 %v525_v0, %v316_v38  ;;  %v320_v46 = vstv %s663_s9  ;;  %s391_s14 = sld [smem:[#allocation8 + $0x13]] }
  0x61   :  { %v223_v40 = vadd.f32 %v222_v33, %v210_v30  ;;  %v235_v43 = vmul.f32 %v420_v39, %v234_v34  ;;  %v308_v45 = vmul.f32 %v307_v36, %v305_v37  ;;  %v260_v52 = vstv %s667_s10 }
  0x62   :  { %429 = vpow2.f32 %v296_v41  ;;  %v318_v47 = vmul.f32 %v317_v42, %v317_v42  ;;  %v273_v57 = vstv %s673_s11 }
  0x63   :  { %v422_v48 = vpop.eup %421  ;;  %v236_v49 = vadd.f32 %v235_v43, %v223_v40  ;;  %v309_v50 = vmul.f32 1.442695, %v308_v45  ;;  %v286_v61 = vstv %s382_s12 }
  0x64   :  { %v248_v51 = vmul.f32 %v422_v48, %v247_v44  ;;  %v321_v53 = vmul.f32 %v320_v46, %v318_v47  ;;  %v299_v2 = vstv %s385_s13 }
  0x65   :  { %431 = vpow2.f32 %v309_v50  ;;  %v312_v6 = vstv %s388_s2 }
  0x66   :  { %v424_v54 = vpop.eup %423  ;;  %v249_v55 = vadd.f32 %v248_v51, %v236_v49  ;;  %v322_v56 = vmul.f32 1.442695, %v321_v53  ;;  %v325_v10 = vstv %s391_s14 }
  0x67   :  { %v261_v0 = vmul.f32 %v424_v54, %v260_v52 }
  0x68   :  { %433 = vpow2.f32 %v322_v56 }
  0x69   :  { %v426_v58 = vpop.eup %425  ;;  %v262_v59 = vadd.f32 %v261_v0, %v249_v55 }
  0x6a   :  { %v274_v60 = vmul.f32 %v426_v58, %v273_v57 }
  0x6c   :  { %v428_v62 = vpop.eup %427  ;;  %v275_v63 = vadd.f32 %v274_v60, %v262_v59 }
  0x6d   :  { %v287_v1 = vmul.f32 %v428_v62, %v286_v61 }
  0x6f   :  { %v430_v3 = vpop.eup %429  ;;  %v288_v4 = vadd.f32 %v287_v1, %v275_v63 }
  0x70   :  { %v300_v5 = vmul.f32 %v430_v3, %v299_v2 }
  0x72   :  { %v432_v7 = vpop.eup %431  ;;  %v301_v8 = vadd.f32 %v300_v5, %v288_v4 }
  0x73   :  { %v313_v9 = vmul.f32 %v432_v7, %v312_v6 }
  0x75   :  { %v434_v11 = vpop.eup %433  ;;  %v314_v12 = vadd.f32 %v313_v9, %v301_v8 }
  0x76   :  { %v326_v13 = vmul.f32 %v434_v11, %v325_v10 }
  0x78   :  { %v327_v14 = vadd.f32 %v326_v13, %v314_v12 }
  0x7a   :  { %328 = vst [vmem:[%s689_s6] sm:$0xff] %v327_v14 }
  0x7b   :  { %333 = vsyncpa [#allocation5], 1 }
  0x7c   :  { %334 = vsyncpa [#allocation7], 1 }

</bundles_post_ra>
